<compile_context>
chip_gen: v5e
topology: v5e:2x2
jax: 0.10.0
libtpu: 0.0.40
codegen_flags: <defaults>
</compile_context>

<pallas_src>
import numpy as np
import jax
import jax.numpy as jnp
from jax.experimental import pallas as pl
from jax.experimental.pallas import tpu as pltpu

# ----------------------------- configuration -----------------------------
EMBED_DIM = 64
SPECTRAL_DIM = EMBED_DIM // 2                 # 32
CALENDAR_DIM = EMBED_DIM - SPECTRAL_DIM       # 32
NUM_SCALES = 4
PER_SCALE = SPECTRAL_DIM // NUM_SCALES        # 8   (each KernelizedTimeEncoder embed_dim)
NFREQ = PER_SCALE // 2                        # 4   (num_frequencies per scale)
NUM_CAL_FEATURES = 11
CAL_SUB = CALENDAR_DIM // NUM_CAL_FEATURES    # 2   (per-calendar-feature sub-dim)
CAL_OUT = 6 * CAL_SUB                         # 12  (actual CalendarTimeEncoder output width)
CONCAT_DIM = SPECTRAL_DIM + CAL_OUT           # 44  (actual input width of final projection)
SCALE_FACTORS = (1.0, 1.0 / 5, 1.0 / 21, 1.0 / 63)
LN_EPS = 1e-5

# packed raw feature layout (width 32):
#   col 0      : t (float day index)          -> enters only through the spectral sin()
#   col 1      : day_of_month
#   col 2      : day_of_year
#   cols 3:10  : one-hot day_of_week  (7)
#   cols 10:22 : one-hot month        (12)
#   cols 22:26 : one-hot quarter      (4)
#   cols 26:32 : binary flags         (6)
RAW_DIM = 32
MAX_TILE_N = 2048


# ------------------------- parameter initialization -----------------------
def init_params(key):
    """Module-style parameters (mirrors the PyTorch submodules)."""
    ks = jax.random.split(key, 11)

    def rnd(k, shape, scale=0.1):
        return scale * jax.random.normal(k, shape, jnp.float32)

    return dict(
        dow_tab=rnd(ks[0], (7, CAL_SUB)),
        mon_tab=rnd(ks[1], (12, CAL_SUB)),
        qtr_tab=rnd(ks[2], (4, CAL_SUB)),
        dom_w=rnd(ks[3], (1, CAL_SUB)),
        dom_b=rnd(ks[4], (1, CAL_SUB)),
        doy_w=rnd(ks[5], (1, CAL_SUB)),
        doy_b=rnd(ks[6], (1, CAL_SUB)),
        bin_w=rnd(ks[7], (6, 6 * CAL_SUB)),
        bin_b=rnd(ks[8], (1, 6 * CAL_SUB)),
        fp_w=rnd(ks[9], (CONCAT_DIM, EMBED_DIM)),
        fp_b=rnd(ks[10], (1, EMBED_DIM)),
        ln_g=jnp.ones((1, EMBED_DIM), jnp.float32),
        ln_b=jnp.zeros((1, EMBED_DIM), jnp.float32),
    )


def build_fused_params(params):
    """Fold all calendar sub-linears + cos phase shift into kernel-ready fused weights (offline)."""
    # --- spectral phase: per-column freq / bias, [sin(NFREQ) | cos(NFREQ)] per scale ---
    inv_freq = 1.0 / (10000.0 ** (np.arange(NFREQ, dtype=np.float32) / NFREQ))
    w_full = np.zeros((1, SPECTRAL_DIM), np.float32)
    b_full = np.zeros((1, SPECTRAL_DIM), np.float32)
    for i, s in enumerate(SCALE_FACTORS):
        base = i * PER_SCALE
        w_full[0, base:base + NFREQ] = s * inv_freq                 # sin columns
        w_full[0, base + NFREQ:base + PER_SCALE] = s * inv_freq     # cos columns
        b_full[0, base + NFREQ:base + PER_SCALE] = np.pi / 2.0      # cos(x) = sin(x + pi/2)
        # trainable time_shift is zero-initialized in the PyTorch module -> no extra bias term

    # --- compose calendar sub-linears with the matching rows of the final projection ---
    fp_w = params["fp_w"]                          # (44, 64); x = [spectral(32), dow, dom, doy, mon, qtr, bin]
    w_spec = fp_w[0:SPECTRAL_DIM]                  # (32, 64)
    w_dow = fp_w[32:34]
    w_dom = fp_w[34:36]
    w_doy = fp_w[36:38]
    w_mon = fp_w[38:40]
    w_qtr = fp_w[40:42]
    w_bin = fp_w[42:44]

    # binary_proj followed by sum over its 6 groups == single (6, CAL_SUB) linear
    bin_w_sum = params["bin_w"].reshape(6, 6, CAL_SUB).sum(axis=1)               # (6, CAL_SUB)
    bin_b_sum = params["bin_b"].reshape(6, CAL_SUB).sum(axis=0, keepdims=True)   # (1, CAL_SUB)

    w_raw = jnp.zeros((RAW_DIM, EMBED_DIM), jnp.float32)
    # row 0 (t) stays zero: t only contributes through sin(phase) @ w_spec
    w_raw = w_raw.at[1].set((params["dom_w"] @ w_dom)[0])
    w_raw = w_raw.at[2].set((params["doy_w"] @ w_doy)[0])
    w_raw = w_raw.at[3:10].set(params["dow_tab"] @ w_dow)
    w_raw = w_raw.at[10:22].set(params["mon_tab"] @ w_mon)
    w_raw = w_raw.at[22:26].set(params["qtr_tab"] @ w_qtr)
    w_raw = w_raw.at[26:32].set(bin_w_sum @ w_bin)

    b_fused = (params["fp_b"]
               + params["dom_b"] @ w_dom
               + params["doy_b"] @ w_doy
               + bin_b_sum @ w_bin)                                               # (1, 64)

    return dict(
        w_full=jnp.asarray(w_full), b_full=jnp.asarray(b_full),
        w_spec=w_spec, w_raw=w_raw, b_fused=b_fused,
        ln_g=params["ln_g"], ln_b=params["ln_b"],
    )


# --------------------- calendar feature extraction (glue) ------------------
def calendar_features(day_idx):
    """Integer day index (base date 2021-01-01) -> calendar features. Pure integer math."""
    days = day_idx.astype(jnp.int32) + 18628          # days since 1970-01-01
    dow = (days + 3) % 7                               # Monday = 0 (1970-01-01 was Thursday)
    # Howard Hinnant civil_from_days
    z = days + 719468
    era = z // 146097
    doe = z - era * 146097
    yoe = (doe - doe // 1460 + doe // 36524 - doe // 146096) // 365
    y = yoe + era * 400
    doy_mar = doe - (365 * yoe + yoe // 4 - yoe // 100)
    mp = (5 * doy_mar + 2) // 153
    dom = doy_mar - (153 * mp + 2) // 5 + 1
    month = jnp.where(mp < 10, mp + 3, mp - 9)         # 1..12
    year = y + (month <= 2).astype(jnp.int32)
    leap = ((year % 4 == 0) & (year % 100 != 0)) | (year % 400 == 0)
    cum = jnp.asarray([0, 31, 59, 90, 120, 151, 181, 212, 243, 273, 304, 334], jnp.int32)
    doy = cum[month - 1] + dom + (leap & (month > 2)).astype(jnp.int32)
    dim_tab = jnp.asarray([31, 28, 31, 30, 31, 30, 31, 31, 30, 31, 30, 31], jnp.int32)
    days_in_month = dim_tab[month - 1] + (leap & (month == 2)).astype(jnp.int32)
    is_ms = dom == 1
    is_me = dom == days_in_month
    is_qs = is_ms & ((month - 1) % 3 == 0)
    is_qe = is_me & (month % 3 == 0)
    is_ys = is_ms & (month == 1)
    is_ye = (month == 12) & (dom == 31)
    binary = jnp.stack([is_ms, is_me, is_qs, is_qe, is_ys, is_ye], axis=-1).astype(jnp.float32)
    quarter = (month - 1) // 3
    return dow, dom.astype(jnp.float32), doy.astype(jnp.float32), month - 1, quarter, binary


def pack_features(flat_idx):
    """Build the lane-dense (n, RAW_DIM) packed per-row feature matrix."""
    dow, dom_f, doy_f, month0, quarter, binary = calendar_features(flat_idx)
    t = flat_idx.astype(jnp.float32)[:, None]
    return jnp.concatenate(
        [t,
         dom_f[:, None],
         doy_f[:, None],
         jax.nn.one_hot(dow, 7, dtype=jnp.float32),
         jax.nn.one_hot(month0, 12, dtype=jnp.float32),
         jax.nn.one_hot(quarter, 4, dtype=jnp.float32),
         binary],
        axis=-1)                                       # (n, 32)


# ------------------------------- Pallas kernel ------------------------------
def hybrid_kernel(p_ref, wfull_ref, bfull_ref, wspec_ref, wraw_ref,
                  bfused_ref, lng_ref, lnb_ref, out_ref):
    f32 = jnp.float32
    p = p_ref[...]                                            # (TILE_N, RAW_DIM)
    t = p[:, 0:1]                                             # (TILE_N, 1)

    # spectral: cos folded into sin via a +pi/2 phase bias -> 32 EUP transcendentals per row
    spectral = jnp.sin(t * wfull_ref[...] + bfull_ref[...])   # (TILE_N, SPECTRAL_DIM)

    # fused projection: all calendar sub-linears pre-folded offline into wraw/bfused
    y = (jnp.dot(spectral, wspec_ref[...], preferred_element_type=f32)
         + jnp.dot(p, wraw_ref[...], preferred_element_type=f32)
         + bfused_ref[...])                                   # (TILE_N, EMBED_DIM)

    # LayerNorm + ReLU
    mu = jnp.mean(y, axis=-1, keepdims=True)
    var = jnp.mean((y - mu) ** 2, axis=-1, keepdims=True)
    y = (y - mu) * jax.lax.rsqrt(var + LN_EPS)
    y = y * lng_ref[...] + lnb_ref[...]
    out_ref[...] = jnp.maximum(y, 0.0)


# --------------------------------- wrapper ----------------------------------
def hybrid_time_encoder(day_indices, fused, *, max_tile=MAX_TILE_N):
    orig_shape = day_indices.shape
    n = int(np.prod(orig_shape))
    flat = day_indices.reshape(n)
    packed = pack_features(flat)                              # (n, RAW_DIM) f32

    # Row tile: large for pipelining; small inputs round up to a multiple of 8 sublanes.
    # At tile=2048: ~1 MiB in + ~1 MiB out per buffer (x2 double-buffering) -> well under
    # the 16 MiB scoped-VMEM default on v5e, so no vmem_limit_bytes override is needed.
    tile = max_tile if n >= max_tile else max(8, ((n + 7) // 8) * 8)
    n_pad = ((n + tile - 1) // tile) * tile
    if n_pad != n:
        packed = jnp.pad(packed, ((0, n_pad - n), (0, 0)))

    row_spec = pl.BlockSpec((tile, RAW_DIM), lambda i: (i, 0))
    out_spec = pl.BlockSpec((tile, EMBED_DIM), lambda i: (i, 0))

    def resident(shape):
        # small parameters: full-array block, stays resident across the grid
        return pl.BlockSpec(shape, lambda i: (0, 0))

    out = pl.pallas_call(
        hybrid_kernel,
        grid=(n_pad // tile,),
        in_specs=[row_spec,
                  resident((1, SPECTRAL_DIM)),
                  resident((1, SPECTRAL_DIM)),
                  resident((SPECTRAL_DIM, EMBED_DIM)),
                  resident((RAW_DIM, EMBED_DIM)),
                  resident((1, EMBED_DIM)),
                  resident((1, EMBED_DIM)),
                  resident((1, EMBED_DIM))],
        out_specs=out_spec,
        out_shape=jax.ShapeDtypeStruct((n_pad, EMBED_DIM), jnp.float32),
        compiler_params=pltpu.CompilerParams(dimension_semantics=("parallel",)),
    )(packed, fused["w_full"], fused["b_full"], fused["w_spec"], fused["w_raw"],
      fused["b_fused"], fused["ln_g"], fused["ln_b"])

    return out[:n].reshape(orig_shape + (EMBED_DIM,))


# ------------------------------ plain-JAX reference -------------------------
def reference(day_indices, params):
    """Un-fused reference on module-style params (explicit sin+cos, explicit calendar linears)."""
    orig_shape = day_indices.shape
    n = int(np.prod(orig_shape))
    flat = day_indices.reshape(n)
    dow, dom_f, doy_f, month0, quarter, binary = calendar_features(flat)
    t = flat.astype(jnp.float32)[:, None]

    inv_freq = 1.0 / (10000.0 ** (np.arange(NFREQ, dtype=np.float32) / NFREQ))
    parts = []
    for s in SCALE_FACTORS:
        ph = (t * s) * inv_freq[None, :]          # time_shift initialized to 0
        parts.append(jnp.sin(ph))
        parts.append(jnp.cos(ph))
    spectral = jnp.concatenate(parts, axis=-1)

    dow_e = params["dow_tab"][dow]
    mon_e = params["mon_tab"][month0]
    qtr_e = params["qtr_tab"][quarter]
    dom_e = dom_f[:, None] * params["dom_w"] + params["dom_b"]
    doy_e = doy_f[:, None] * params["doy_w"] + params["doy_b"]
    bin_full = binary @ params["bin_w"] + params["bin_b"]
    bin_e = bin_full.reshape(n, 6, CAL_SUB).sum(axis=1)
    cal = jnp.concatenate([dow_e, dom_e, doy_e, mon_e, qtr_e, bin_e], axis=-1)

    x = jnp.concatenate([spectral, cal], axis=-1)
    y = x @ params["fp_w"] + params["fp_b"]
    mu = y.mean(-1, keepdims=True)
    var = ((y - mu) ** 2).mean(-1, keepdims=True)
    y = (y - mu) / jnp.sqrt(var + LN_EPS) * params["ln_g"] + params["ln_b"]
    return jnp.maximum(y, 0.0).reshape(orig_shape + (EMBED_DIM,))


# ----------------------------------- main ------------------------------------
if __name__ == "__main__":
    key = jax.random.PRNGKey(0)
    pkey, dkey = jax.random.split(key)
    params = init_params(pkey)
    fused = build_fused_params(params)

    # day indices (integer days since 2021-01-01), shape (batch=2, seq=8)
    day_indices = jax.random.randint(dkey, (2, 8), 0, 1500, dtype=jnp.int32)

    out = hybrid_time_encoder(day_indices, fused)
    out = jax.block_until_ready(out)

    ref = reference(day_indices, params)
    np.testing.assert_allclose(np.asarray(out), np.asarray(ref), rtol=2e-4, atol=2e-4)
    print("KERNEL_OK")
</pallas_src>

<mosaic_0001>
module attributes {stable_mosaic.version = 11 : i64} {
  func.func @hybrid_kernel(%arg0: i32, %arg1: memref<16x32xf32, #tpu.memory_space<vmem>>, %arg2: memref<1x32xf32, #tpu.memory_space<vmem>>, %arg3: memref<1x32xf32, #tpu.memory_space<vmem>>, %arg4: memref<32x64xf32, #tpu.memory_space<vmem>>, %arg5: memref<32x64xf32, #tpu.memory_space<vmem>>, %arg6: memref<1x64xf32, #tpu.memory_space<vmem>>, %arg7: memref<1x64xf32, #tpu.memory_space<vmem>>, %arg8: memref<1x64xf32, #tpu.memory_space<vmem>>, %arg9: memref<16x64xf32, #tpu.memory_space<vmem>>) attributes {dimension_semantics = [#tpu.dimension_semantics<parallel>], iteration_bounds = array<i64: 1>, scalar_prefetch = 0 : i64, scratch_operands = 0 : i64, tpu.core_type = #tpu.core_type<tc>, window_params = [{transform_indices = @transform_0, window_bounds = array<i64: 16, 32>}, {pipeline_mode = #tpu.pipeline_mode<synchronous>, transform_indices = @transform_1, window_bounds = array<i64: 1, 32>}, {pipeline_mode = #tpu.pipeline_mode<synchronous>, transform_indices = @transform_2, window_bounds = array<i64: 1, 32>}, {pipeline_mode = #tpu.pipeline_mode<synchronous>, transform_indices = @transform_3, window_bounds = array<i64: 32, 64>}, {pipeline_mode = #tpu.pipeline_mode<synchronous>, transform_indices = @transform_4, window_bounds = array<i64: 32, 64>}, {pipeline_mode = #tpu.pipeline_mode<synchronous>, transform_indices = @transform_5, window_bounds = array<i64: 1, 64>}, {pipeline_mode = #tpu.pipeline_mode<synchronous>, transform_indices = @transform_6, window_bounds = array<i64: 1, 64>}, {pipeline_mode = #tpu.pipeline_mode<synchronous>, transform_indices = @transform_7, window_bounds = array<i64: 1, 64>}, {transform_indices = @transform_8, window_bounds = array<i64: 16, 64>}]} {
    %c0 = arith.constant 0 : index
    %c0_0 = arith.constant 0 : index
    %0 = vector.load %arg1[%c0, %c0_0] : memref<16x32xf32, #tpu.memory_space<vmem>>, vector<16x32xf32>
    %1 = vector.extract_strided_slice %0 {offsets = [0, 0], sizes = [16, 1], strides = [1, 1]} : vector<16x32xf32> to vector<16x1xf32>
    %c0_1 = arith.constant 0 : index
    %c0_2 = arith.constant 0 : index
    %2 = vector.load %arg2[%c0_1, %c0_2] : memref<1x32xf32, #tpu.memory_space<vmem>>, vector<1x32xf32>
    %3 = vector.broadcast %1 : vector<16x1xf32> to vector<16x32xf32>
    %4 = vector.broadcast %2 : vector<1x32xf32> to vector<16x32xf32>
    %5 = arith.mulf %3, %4 : vector<16x32xf32>
    %c0_3 = arith.constant 0 : index
    %c0_4 = arith.constant 0 : index
    %6 = vector.load %arg3[%c0_3, %c0_4] : memref<1x32xf32, #tpu.memory_space<vmem>>, vector<1x32xf32>
    %7 = vector.broadcast %6 : vector<1x32xf32> to vector<16x32xf32>
    %8 = arith.addf %5, %7 : vector<16x32xf32>
    %9 = math.sin %8 : vector<16x32xf32>
    %c0_5 = arith.constant 0 : index
    %c0_6 = arith.constant 0 : index
    %10 = vector.load %arg4[%c0_5, %c0_6] : memref<32x64xf32, #tpu.memory_space<vmem>>, vector<32x64xf32>
    %cst = arith.constant dense<0.000000e+00> : vector<16x64xf32>
    %11 = tpu.matmul %9, %10, %cst {dimension_numbers = #tpu.dot_dimension_numbers<[1], [0], [0], [1], [0, 0, 1, 1], [], []>} : vector<16x32xf32>, vector<32x64xf32>, vector<16x64xf32> -> vector<16x64xf32>
    %c0_7 = arith.constant 0 : index
    %c0_8 = arith.constant 0 : index
    %12 = vector.load %arg5[%c0_7, %c0_8] : memref<32x64xf32, #tpu.memory_space<vmem>>, vector<32x64xf32>
    %cst_9 = arith.constant dense<0.000000e+00> : vector<16x64xf32>
    %13 = tpu.matmul %0, %12, %cst_9 {dimension_numbers = #tpu.dot_dimension_numbers<[1], [0], [0], [1], [0, 0, 1, 1], [], []>} : vector<16x32xf32>, vector<32x64xf32>, vector<16x64xf32> -> vector<16x64xf32>
    %14 = arith.addf %11, %13 : vector<16x64xf32>
    %c0_10 = arith.constant 0 : index
    %c0_11 = arith.constant 0 : index
    %15 = vector.load %arg6[%c0_10, %c0_11] : memref<1x64xf32, #tpu.memory_space<vmem>>, vector<1x64xf32>
    %16 = vector.broadcast %15 : vector<1x64xf32> to vector<16x64xf32>
    %17 = arith.addf %14, %16 : vector<16x64xf32>
    %cst_12 = arith.constant dense<0.000000e+00> : vector<16xf32>
    %18 = vector.multi_reduction <add>, %17, %cst_12 [1] : vector<16x64xf32> to vector<16xf32>
    %19 = vector.shape_cast %18 : vector<16xf32> to vector<16x1xf32>
    %cst_13 = arith.constant 6.400000e+01 : f32
    %20 = vector.broadcast %cst_13 : f32 to vector<16x1xf32>
    %21 = arith.divf %19, %20 : vector<16x1xf32>
    %22 = vector.broadcast %21 : vector<16x1xf32> to vector<16x64xf32>
    %23 = arith.subf %17, %22 : vector<16x64xf32>
    %24 = arith.mulf %23, %23 : vector<16x64xf32>
    %cst_14 = arith.constant dense<0.000000e+00> : vector<16xf32>
    %25 = vector.multi_reduction <add>, %24, %cst_14 [1] : vector<16x64xf32> to vector<16xf32>
    %26 = vector.shape_cast %25 : vector<16xf32> to vector<16x1xf32>
    %cst_15 = arith.constant 6.400000e+01 : f32
    %27 = vector.broadcast %cst_15 : f32 to vector<16x1xf32>
    %28 = arith.divf %26, %27 : vector<16x1xf32>
    %29 = vector.broadcast %21 : vector<16x1xf32> to vector<16x64xf32>
    %30 = arith.subf %17, %29 : vector<16x64xf32>
    %cst_16 = arith.constant 9.99999974E-6 : f32
    %31 = vector.broadcast %cst_16 : f32 to vector<16x1xf32>
    %32 = arith.addf %28, %31 : vector<16x1xf32>
    %33 = math.rsqrt %32 : vector<16x1xf32>
    %34 = vector.broadcast %33 : vector<16x1xf32> to vector<16x64xf32>
    %35 = arith.mulf %30, %34 : vector<16x64xf32>
    %c0_17 = arith.constant 0 : index
    %c0_18 = arith.constant 0 : index
    %36 = vector.load %arg7[%c0_17, %c0_18] : memref<1x64xf32, #tpu.memory_space<vmem>>, vector<1x64xf32>
    %37 = vector.broadcast %36 : vector<1x64xf32> to vector<16x64xf32>
    %38 = arith.mulf %35, %37 : vector<16x64xf32>
    %c0_19 = arith.constant 0 : index
    %c0_20 = arith.constant 0 : index
    %39 = vector.load %arg8[%c0_19, %c0_20] : memref<1x64xf32, #tpu.memory_space<vmem>>, vector<1x64xf32>
    %40 = vector.broadcast %39 : vector<1x64xf32> to vector<16x64xf32>
    %41 = arith.addf %38, %40 : vector<16x64xf32>
    %cst_21 = arith.constant 0.000000e+00 : f32
    %42 = vector.broadcast %cst_21 : f32 to vector<16x64xf32>
    %43 = arith.maximumf %41, %42 : vector<16x64xf32>
    %c0_22 = arith.constant 0 : index
    %c0_23 = arith.constant 0 : index
    %44 = vector.load %arg9[%c0_22, %c0_23] : memref<16x64xf32, #tpu.memory_space<vmem>>, vector<16x64xf32>
    tpu.vector_store %arg9[%c0_22, %c0_23], %43 {strides = array<i32>} : memref<16x64xf32, #tpu.memory_space<vmem>>, vector<16x64xf32>,
    return
  }
  func.func @transform_0(%arg0: i32) -> (i32, i32) {
    %c0_i32 = arith.constant 0 : i32
    %c0_i32_0 = arith.constant 0 : i32
    return %arg0, %c0_i32 : i32, i32
  }
  func.func @transform_1(%arg0: i32) -> (i32, i32) {
    %c0_i32 = arith.constant 0 : i32
    %c0_i32_0 = arith.constant 0 : i32
    %c0_i32_1 = arith.constant 0 : i32
    return %c0_i32, %c0_i32_0 : i32, i32
  }
  func.func @transform_2(%arg0: i32) -> (i32, i32) {
    %c0_i32 = arith.constant 0 : i32
    %c0_i32_0 = arith.constant 0 : i32
    %c0_i32_1 = arith.constant 0 : i32
    return %c0_i32, %c0_i32_0 : i32, i32
  }
  func.func @transform_3(%arg0: i32) -> (i32, i32) {
    %c0_i32 = arith.constant 0 : i32
    %c0_i32_0 = arith.constant 0 : i32
    %c0_i32_1 = arith.constant 0 : i32
    return %c0_i32, %c0_i32_0 : i32, i32
  }
  func.func @transform_4(%arg0: i32) -> (i32, i32) {
    %c0_i32 = arith.constant 0 : i32
    %c0_i32_0 = arith.constant 0 : i32
    %c0_i32_1 = arith.constant 0 : i32
    return %c0_i32, %c0_i32_0 : i32, i32
  }
  func.func @transform_5(%arg0: i32) -> (i32, i32) {
    %c0_i32 = arith.constant 0 : i32
    %c0_i32_0 = arith.constant 0 : i32
    %c0_i32_1 = arith.constant 0 : i32
    return %c0_i32, %c0_i32_0 : i32, i32
  }
  func.func @transform_6(%arg0: i32) -> (i32, i32) {
    %c0_i32 = arith.constant 0 : i32
    %c0_i32_0 = arith.constant 0 : i32
    %c0_i32_1 = arith.constant 0 : i32
    return %c0_i32, %c0_i32_0 : i32, i32
  }
  func.func @transform_7(%arg0: i32) -> (i32, i32) {
    %c0_i32 = arith.constant 0 : i32
    %c0_i32_0 = arith.constant 0 : i32
    %c0_i32_1 = arith.constant 0 : i32
    return %c0_i32, %c0_i32_0 : i32, i32
  }
  func.func @transform_8(%arg0: i32) -> (i32, i32) {
    %c0_i32 = arith.constant 0 : i32
    %c0_i32_0 = arith.constant 0 : i32
    return %arg0, %c0_i32 : i32, i32
  }
}

</mosaic_0001>

<bundles_post_ra>
// kernel: tpu_custom_call.1
= control target key start
LH: loop header
LB: loop body
LE: loop exit
PB: predicated region body
PF: predicated region fallthrough
CT: control target
= control target key end

     0   :  { %13 = vsyncpa [#allocation3], 0  ;;  %s1037_s0 = inlined_call_operand.hbm [shape: f32[16,32], index: 0, kind: input, shape index: {}]   ;;  %s1038_s1 = inlined_call_operand.hbm [shape: f32[1,32], index: 1, kind: input, shape index: {}]   ;;  %s1039_s2 = inlined_call_operand.vmem [shape: f32[1,32], index: 2, kind: input, shape index: {}]   ;;  %s1040_s3 = inlined_call_operand.hbm [shape: f32[32,64], index: 3, kind: input, shape index: {}]   ;;  %s1041_s4 = inlined_call_operand.hbm [shape: f32[32,64], index: 4, kind: input, shape index: {}]   ;;  %s1042_s5 = inlined_call_operand.vmem [shape: f32[1,64], index: 5, kind: input, shape index: {}]   ;;  %s1043_s6 = inlined_call_operand.vmem [shape: f32[1,64], index: 6, kind: input, shape index: {}]   ;;  %s1044_s7 = inlined_call_operand.vmem [shape: f32[1,64], index: 7, kind: input, shape index: {}]   ;;  %s1045_s8 = inlined_call_operand.hbm [shape: f32[16,64], index: 8, kind: output, shape index: {}]  }
   0x1   :  { %14 = vsyncpa [#allocation6], 0 }
   0x2   :  { %15 = vsyncpa [#allocation9], 0  ;;  %s35_s29 = sshll.u32 %s1038_s1, 4  ;;  %s36_s29 = int_to_ptr.hbm [resolvable:$true] %s35_s29 }
   0x3   :  { %16 = vsyncpa [#allocation4], 0  ;;  %s758_s30 = smov [#allocation5]   ;;  %s21_s12 = sshll.u32 %s1037_s0, 4  ;;  %s22_s12 = int_to_ptr.hbm [resolvable:$true] %s21_s12 }
   0x4   :  { %s37_s9 = sshll.u32 %s758_s30, 4  ;;  %s759_s13 = smov [#allocation2]   ;;  %s38_s9 = int_to_ptr.vmem [resolvable:$true] %s37_s9 }
   0x5   :  { %40 = dma.hbm_to_vmem [thread:$0]  %s36_s29, 16, %s38_s9, [#allocation6]  }
   0x6   :  { %s23_s14 = sshll.u32 %s759_s13, 4  ;;  %s760_s15 = smov 128   ;;  %s24_s14 = int_to_ptr.vmem [resolvable:$true] %s23_s14 }
   0x7   :  { %s761_s16 = smov 8   ;;  %s47_s18 = sshll.u32 %s1040_s3, 4  ;;  %s48_s18 = int_to_ptr.hbm [resolvable:$true] %s47_s18 }
   0x8   :  { %29 = dma.hbm_to_vmem [thread:$0]  %s22_s12, 256, %s24_s14, [#allocation3], %s760_s15, %s760_s15, %s761_s16  }
   0x9   :  { %s762_s19 = smov [#allocation7]   ;;  %s60_s22 = sshll.u32 %s1041_s4, 4  ;;  %s61_s22 = int_to_ptr.hbm [resolvable:$true] %s60_s22 }
   0xa   :  { %s49_s20 = sshll.u32 %s762_s19, 4  ;;  %s763_s23 = smov [#allocation8]   ;;  %s50_s20 = int_to_ptr.vmem [resolvable:$true] %s49_s20 }
   0xb   :  { %55 = dma.hbm_to_vmem [thread:$0]  %s48_s18, 512, %s50_s20, [#allocation6], %s760_s15, %s760_s15, %s761_s16  }
   0xc   :  { %s62_s24 = sshll.u32 %s763_s23, 4  ;;  %s63_s24 = int_to_ptr.vmem [resolvable:$true] %s62_s24 }
   0xd   :  { %68 = dma.hbm_to_vmem [thread:$0]  %s61_s22, 512, %s63_s24, [#allocation9], %s760_s15, %s760_s15, %s761_s16  }
   0xe   :  { %750 = dma.done.wait [#allocation3], 256  }
   0xf   :  { %751 = vsyncadd [#allocation3], 4294967040 }
  0x10   :  { %752 = dma.done.wait [#allocation6], 528  }
  0x11   :  { %753 = vsyncadd [#allocation6], 4294966768 }
  0x12   :  { %754 = dma.done.wait [#allocation9], 512  }
  0x13   :  { %755 = vsyncadd [#allocation9], 4294966784  ;;  %v764_v0 = vmov 0   ;;  %v92_v1 = vld [vmem:[#allocation2 + $0x8] sm:$0xff]  ;;  %v91_v2 = vld [vmem:[#allocation2] sm:$0xff]  ;;  %vm433_vm0 = vcmask 261120  }
  0x14   :  { %618 = vset.pattern.permute.xlu0 %v764_v0  ;;  %v619_v3 = vld [vmem:[#allocation5] ss:$0 sm:$0xff]  ;;  %v620_v4 = vld [vmem:[%s1039_s2] ss:$0 sm:$0xff]  ;;  %v431_v8 = vld [vmem:[#allocation8 + $0x10] sm:$0xff] }
  0x15   :  { %101 = vperm.xlu0 %618, %v92_v1   ;;  %v432_v6 = vld [vmem:[#allocation8 + $0x18] sm:$0xff]  ;;  %v427_v10 = vld [vmem:[#allocation7 + $0x10] sm:$0xff]  ;;  %v430_v11 = vld [vmem:[#allocation8 + $0x8] sm:$0xff]  ;;  %v765_v35 = vmov 2102212464  }
  0x16   :  { %v428_v7 = vld [vmem:[#allocation7 + $0x18] sm:$0xff]  ;;  %595 = vmatpush.msra.mxu2 %v432_v6  ;;  %v426_v12 = vld [vmem:[#allocation7 + $0x8] sm:$0xff]  ;;  %450 = vmatpush.msra.mxu0 %v432_v6  ;;  %v429_v14 = vld [vmem:[#allocation8] sm:$0xff]  ;;  %v766_v37 = vmov 920167782  }
  0x17   :  { %599 = vmatpush.msra.mxu3 %v428_v7  ;;  %479 = vmatpush.msra.mxu1 %v428_v7  ;;  %v425_v15 = vld [vmem:[#allocation7] sm:$0xff]  ;;  %v767_v40 = vmov 683565275   ;;  %v768_v43 = vmov 1326507024  }
  0x18   :  { %596 = vmatpush.msra.mxu2 %v431_v8  ;;  %451 = vmatpush.msra.mxu0 %v431_v8  ;;  %v769_v45 = vmov 2475754826   ;;  %v770_v49 = vmov 2131351028  }
  0x19   :  { %600 = vmatpush.msra.mxu3 %v427_v10  ;;  %480 = vmatpush.msra.mxu1 %v427_v10 }
  0x1a   :  { %597 = vmatpush.msra.mxu2 %v430_v11  ;;  %452 = vmatpush.msra.mxu0 %v430_v11 }
  0x1b   :  { %601 = vmatpush.msra.mxu3 %v426_v12  ;;  %481 = vmatpush.msra.mxu1 %v426_v12 }
  0x1c   :  { %598 = vmatpush.msra.mxu2 %v429_v14  ;;  %453 = vmatpush.msra.mxu0 %v429_v14 }
  0x1d   :  { %96 = vperm.xlu0 %618, %v91_v2   ;;  %602 = vmatpush.msra.mxu3 %v425_v15 }
  0x1e   :  { %592 = vmatmul.msk.f32.vlgmr.msra.gmra.mxu2 %vm433_vm0, %v92_v1  ;;  %482 = vmatpush.msra.mxu1 %v425_v15 }
  0x1f   :  { %591 = vmatmul.msk.f32.vlgmr.msra.gmra.mxu0 %vm433_vm0, %v91_v2 }
  0x87   :  { %v102_v5 = vpop.permute.xlu0 %101 }
  0x88   :  { %v108_v9 = vmul.f32 %v619_v3, %v102_v5 }
  0x8a   :  { %v843_v13 = vadd.f32 %v620_v4, %v108_v9 }
  0x8c   :  { %v273_v16 = vand.u32 2139095040, %v843_v13  ;;  %v270_v17 = vand.u32 2147483647, %v843_v13 }
  0x8e   :  { %v274_v18 = vshrl.u32 %v273_v16, 23  ;;  %v277_v19 = vand.u32 8388607, %v270_v17 }
  0x8f   :  { %v97_v20 = vpop.permute.xlu0 %96 }
  0x90   :  { %v588_v21 = vadd.s32 4294967169, %v274_v18  ;;  %v107_v22 = vmul.f32 %v619_v3, %v97_v20  ;;  %v278_v23 = vor.u32 8388608, %v277_v19 }
  0x92   :  { %v280_v24 = vadd.s32 1, %v588_v21  ;;  %v851_v25 = vadd.f32 %v620_v4, %v107_v22  ;;  %v854_v27 = vshll.u32 %v278_v23, 8 }
  0x94   :  { %vm281_vm1 = vcmp.gt.s32.totalorder %v280_v24, 0  ;;  %v118_v26 = vand.u32 2139095040, %v851_v25  ;;  %v859_v33 = vand.u32 65535, %v854_v27  ;;  %v115_v34 = vand.u32 2147483647, %v851_v25 }
  0x95   :  { %v282_v28 = vsel %vm281_vm1, %v280_v24, 0  ;;  %v320_v19 = vshrl.u32 %v854_v27, 16 }
  0x96   :  { %v284_v29 = vand.u32 31, %v282_v28  ;;  %v119_v30 = vshrl.u32 %v118_v26, 23  ;;  %v856_v31 = vshrl.u32 %v282_v28, 5  ;;  %v877_v5 = vand.u32 8388607, %v115_v34 }
  0x98   :  { %v285_v32 = vsub.s32 32, %v284_v29  ;;  %v296_v36 = vshll.u32 %v765_v35, %v284_v29  ;;  %v299_v38 = vshll.u32 %v766_v37, %v284_v29  ;;  %v585_v39 = vadd.s32 4294967169, %v119_v30 }
  0x99   :  { %v287_v41 = vshll.u32 %v767_v40, %v284_v29  ;;  %v290_v47 = vshll.u32 %v769_v45, %v284_v29  ;;  %v293_v51 = vshll.u32 %v770_v49, %v284_v29  ;;  %vm305_vm2 = vcmp.lt.s32.totalorder %v856_v31, 4 }
  0x9a   :  { %v297_v42 = vshrl.u32 %v766_v37, %v285_v32  ;;  %v300_v44 = vshrl.u32 %v768_v43, %v285_v32  ;;  %v288_v46 = vshrl.u32 %v769_v45, %v285_v32  ;;  %v125_v48 = vadd.s32 1, %v585_v39 }
  0x9b   :  { %v291_v50 = vshrl.u32 %v770_v49, %v285_v32  ;;  %v294_v52 = vshrl.u32 %v765_v35, %v285_v32  ;;  %v286_v56 = vshrl.u32 %v767_v40, %v285_v32  ;;  %vm302_vm4 = vcmp.lt.s32.totalorder %v856_v31, 1 }
  0x9c   :  { %v298_v53 = vor.u32 %v297_v42, %v296_v36  ;;  %v301_v54 = vor.u32 %v300_v44, %v299_v38  ;;  %v289_v55 = vor.u32 %v288_v46, %v287_v41  ;;  %vm126_vm3 = vcmp.gt.s32.totalorder %v125_v48, 0 }
  0x9d   :  { %v292_v57 = vor.u32 %v291_v50, %v290_v47  ;;  %v295_v58 = vor.u32 %v294_v52, %v293_v51  ;;  %v127_v61 = vsel %vm126_vm3, %v125_v48, 0  ;;  %vm304_vm5 = vcmp.lt.s32.totalorder %v856_v31, 3 }
  0x9e   :  { %v311_v59 = vsel %vm305_vm2, %v298_v53, 920167782  ;;  %v315_v60 = vsel %vm305_vm2, %v301_v54, 1326507024  ;;  %v872_v62 = vand.u32 31, %v127_v61  ;;  %v879_v6 = vshrl.u32 %v127_v61, 5 }
  0x9f   :  { %v307_v63 = vsel %vm305_vm2, %v295_v58, 2102212464  ;;  %v310_v1 = vsel %vm302_vm4, %v289_v55, %v292_v57  ;;  %v312_v2 = vsel %vm304_vm5, %v295_v58, %v311_v59  ;;  %v314_v3 = vsel %vm302_vm4, %v292_v57, %v295_v58 }
  0xa0   :  { %v316_v4 = vsel %vm304_vm5, %v298_v53, %v315_v60  ;;  %v882_v7 = vsub.s32 32, %v872_v62  ;;  %vm303_vm6 = vcmp.lt.s32.totalorder %v856_v31, 2  ;;  %v306_v8 = vsel %vm302_vm4, %v286_v56, %v289_v55 }
  0xa1   :  { %v144_v9 = vshll.u32 %v766_v37, %v872_v62  ;;  %v308_v10 = vsel %vm304_vm5, %v292_v57, %v307_v63  ;;  %v313_v11 = vsel %vm303_vm6, %v310_v1, %v312_v2  ;;  %v317_v12 = vsel %vm303_vm6, %v314_v3, %v316_v4 }
  0xa2   :  { %v142_v14 = vshrl.u32 %v766_v37, %v882_v7  ;;  %v145_v15 = vshrl.u32 %v768_v43, %v882_v7  ;;  %v321_v16 = vand.u32 65535, %v317_v12  ;;  %v322_v18 = vshrl.u32 %v317_v12, 16 }
  0xa3   :  { %v343_v20 = vand.u32 65535, %v313_v11  ;;  %v344_v21 = vshrl.u32 %v313_v11, 16  ;;  %v141_v22 = vshll.u32 %v765_v35, %v872_v62  ;;  %vm150_vm7 = vcmp.lt.s32.totalorder %v879_v6, 4 }
  0xa4   :  { %v146_v23 = vor.u32 %v145_v15, %v144_v9  ;;  %v324_v24 = vmul.u32 %v322_v18, %v859_v33  ;;  %v899_v26 = vsel %vm303_vm6, %v306_v8, %v308_v10  ;;  %v325_v28 = vmul.u32 %v321_v16, %v320_v19 }
  0xa5   :  { %v346_v29 = vmul.u32 %v344_v21, %v859_v33  ;;  %v123_v30 = vor.u32 8388608, %v877_v5  ;;  %v143_v32 = vor.u32 %v142_v14, %v141_v22  ;;  %v323_v36 = vmul.u32 %v321_v16, %v859_v33 }
  0xa6   :  { %v326_v37 = vmul.u32 %v322_v18, %v320_v19  ;;  %v327_v38 = vshll.u32 %v324_v24, 16  ;;  %v160_v39 = vsel %vm150_vm7, %v146_v23, 1326507024  ;;  %v328_v41 = vshrl.u32 %v324_v24, 16 }
  0xa7   :  { %v345_v42 = vmul.u32 %v343_v20, %v859_v33  ;;  %v347_v43 = vmul.u32 %v343_v20, %v320_v19  ;;  %v329_v31 = vshll.u32 %v325_v28, 16  ;;  %v349_v46 = vshll.u32 %v346_v29, 16 }
  0xa8   :  { %vm331_vm8 = vc.u32 %v323_v36, %v327_v38  ;;  %v333_v44 = vadd.s32 %v327_v38, %v323_v36  ;;  %v330_v47 = vshrl.u32 %v325_v28, 16  ;;  %v348_v50 = vmul.u32 %v344_v21, %v320_v19 }
  0xa9   :  { %v332_v48 = vsel %vm331_vm8, 1, %v764_v0  ;;  %v351_v51 = vshll.u32 %v347_v43, 16  ;;  %vm353_vm10 = vc.u32 %v345_v42, %v349_v46  ;;  %v355_v53 = vadd.s32 %v349_v46, %v345_v42 }
  0xaa   :  { %v334_v52 = vadd.s32 %v332_v48, %v326_v37  ;;  %vm335_vm9 = vc.u32 %v333_v44, %v329_v31  ;;  %v354_v55 = vsel %vm353_vm10, 1, %v764_v0  ;;  %v132_v33 = vshll.u32 %v767_v40, %v872_v62 }
  0xab   :  { %v336_v54 = vsel %vm335_vm9, 1, %v764_v0  ;;  %v133_v56 = vshrl.u32 %v769_v45, %v882_v7  ;;  %v350_v58 = vshrl.u32 %v346_v29, 16  ;;  %v356_v59 = vadd.s32 %v354_v55, %v348_v50 }
  0xac   :  { %v338_v57 = vadd.s32 %v336_v54, %v334_v52  ;;  %vm357_vm11 = vc.u32 %v355_v53, %v351_v51  ;;  %v135_v63 = vshll.u32 %v769_v45, %v872_v62  ;;  %v136_v1 = vshrl.u32 %v770_v49, %v882_v7 }
  0xad   :  { %v358_v60 = vsel %vm357_vm11, 1, %v764_v0  ;;  %v915_v61 = vor.u32 %v133_v56, %v132_v33  ;;  %v138_v4 = vshll.u32 %v770_v49, %v872_v62  ;;  %v139_v5 = vshrl.u32 %v765_v35, %v882_v7 }
  0xae   :  { %v339_v2 = vadd.s32 %v338_v57, %v328_v41  ;;  %v360_v3 = vadd.s32 %v358_v60, %v356_v59  ;;  %v156_v8 = vsel %vm150_vm7, %v143_v32, 920167782  ;;  %v352_v9 = vshrl.u32 %v347_v43, 16 }
  0xaf   :  { %v927_v10 = vor.u32 %v136_v1, %v135_v63  ;;  %vm147_vm12 = vcmp.lt.s32.totalorder %v879_v6, 1  ;;  %v140_v12 = vor.u32 %v139_v5, %v138_v4  ;;  %vm149_vm13 = vcmp.lt.s32.totalorder %v879_v6, 3 }
  0xb0   :  { %v930_v45 = vadd.s32 %v339_v2, %v330_v47  ;;  %v361_v11 = vadd.s32 %v360_v3, %v350_v58  ;;  %v933_v14 = vadd.s32 %v355_v53, %v351_v51  ;;  %v161_v49 = vsel %vm149_vm13, %v143_v32, %v160_v39 }
  0xb1   :  { %v155_v35 = vsel %vm147_vm12, %v915_v61, %v927_v10  ;;  %v941_v62 = vshll.u32 %v123_v30, 8  ;;  %v363_v16 = vmul.u32 %v854_v27, %v899_v26  ;;  %vm148_vm15 = vcmp.lt.s32.totalorder %v879_v6, 2 }
  0xb2   :  { %v362_v15 = vadd.s32 %v361_v11, %v352_v9  ;;  %vm365_vm14 = vc.u32 %v930_v45, %v933_v14  ;;  %v157_v18 = vsel %vm149_vm13, %v140_v12, %v156_v8  ;;  %v159_v19 = vsel %vm147_vm12, %v927_v10, %v140_v12 }
  0xb3   :  { %v158_v21 = vsel %vm148_vm15, %v155_v35, %v157_v18  ;;  %v162_v22 = vsel %vm148_vm15, %v159_v19, %v161_v49  ;;  %v164_v27 = vand.u32 65535, %v941_v62  ;;  %v165_v23 = vshrl.u32 %v941_v62, 16 }
  0xb4   :  { %v366_v20 = vadd.s32 1, %v362_v15  ;;  %v166_v24 = vand.u32 65535, %v162_v22  ;;  %v167_v26 = vshrl.u32 %v162_v22, 16  ;;  %v188_v28 = vand.u32 65535, %v158_v21 }
  0xb5   :  { %v189_v30 = vshrl.u32 %v158_v21, 16  ;;  %v131_v1 = vshrl.u32 %v767_v40, %v882_v7  ;;  %v152_v2 = vsel %vm150_vm7, %v140_v12, 2102212464  ;;  %vm272_vm9 = vcmp.lt.s32.totalorder %v843_v13, 0 }
  0xb6   :  { %v367_v29 = vsel %vm365_vm14, %v366_v20, %v362_v15  ;;  %v169_v36 = vmul.u32 %v167_v26, %v164_v27  ;;  %v170_v37 = vmul.u32 %v166_v24, %v165_v23  ;;  %v192_v39 = vmul.u32 %v188_v28, %v165_v23 }
  0xb7   :  { %v368_v32 = vadd.s32 %v367_v29, %v363_v16  ;;  %v191_v38 = vmul.u32 %v189_v30, %v164_v27  ;;  %v168_v42 = vmul.u32 %v166_v24, %v164_v27  ;;  %v171_v31 = vmul.u32 %v167_v26, %v165_v23 }
  0xb8   :  { %v172_v43 = vshll.u32 %v169_v36, 16  ;;  %v190_v44 = vmul.u32 %v188_v28, %v164_v27  ;;  %v174_v48 = vshll.u32 %v170_v37, 16  ;;  %v196_v52 = vshll.u32 %v192_v39, 16 }
  0xb9   :  { %v369_v41 = vadd.s32 536870912, %v368_v32  ;;  %v194_v46 = vshll.u32 %v191_v38, 16  ;;  %v193_v33 = vmul.u32 %v189_v30, %v165_v23  ;;  %v173_v59 = vshrl.u32 %v169_v36, 16 }
  0xba   :  { %vm176_vm1 = vc.u32 %v168_v42, %v172_v43  ;;  %v178_v50 = vadd.s32 %v172_v43, %v168_v42  ;;  %v175_v5 = vshrl.u32 %v170_v37, 16  ;;  %v195_v9 = vshrl.u32 %v191_v38, 16 }
  0xbb   :  { %v959_v47 = vshrl.u32 %v369_v41, 30  ;;  %v177_v51 = vsel %vm176_vm1, 1, %v764_v0  ;;  %vm198_vm2 = vc.u32 %v190_v44, %v194_v46  ;;  %v200_v53 = vadd.s32 %v194_v46, %v190_v44 }
  0xbc   :  { %v179_v55 = vadd.s32 %v177_v51, %v171_v31  ;;  %vm180_vm3 = vc.u32 %v178_v50, %v174_v48  ;;  %v199_v57 = vsel %vm198_vm2, 1, %v764_v0  ;;  %v151_v49 = vsel %vm147_vm12, %v131_v1, %v915_v61 }
  0xbd   :  { %v371_v54 = vshll.u32 %v959_v47, 30  ;;  %v181_v56 = vsel %vm180_vm3, 1, %v764_v0  ;;  %vm202_vm4 = vc.u32 %v200_v53, %v196_v52  ;;  %v201_v63 = vadd.s32 %v199_v57, %v193_v33 }
  0xbe   :  { %v183_v60 = vadd.s32 %v181_v56, %v179_v55  ;;  %v203_v3 = vsel %vm202_vm4, 1, %v764_v0  ;;  %v153_v40 = vsel %vm149_vm13, %v927_v10, %v152_v2  ;;  %v197_v12 = vshrl.u32 %v192_v39, 16 }
  0xbf   :  { %v372_v58 = vsub.s32 %v368_v32, %v371_v54  ;;  %v205_v11 = vadd.s32 %v203_v3, %v201_v63  ;;  %v204_v0 = vadd.s32 %v200_v53, %v196_v52  ;;  %v154_v19 = vsel %vm148_vm15, %v151_v49, %v153_v40 }
  0xc0   :  { %v184_v8 = vadd.s32 %v183_v60, %v173_v59  ;;  %v208_v61 = vmul.u32 %v941_v62, %v154_v19  ;;  %v364_v27 = vadd.s32 %v933_v14, %v930_v45  ;;  %vm987_vm10 = vcmp.le.f32.partialorder %v270_v17, 0.7853982 }
  0xc1   :  { %vm373_vm5 = vcmp.lt.s32.totalorder %v372_v58, 0  ;;  %v374_v4 = vsub.s32 0, %v372_v58  ;;  %v206_v16 = vadd.s32 %v205_v11, %v195_v9  ;;  %v394_v50 = vsub.s32 4, %v959_v47 }
  0xc2   :  { %v185_v7 = vadd.s32 %v184_v8, %v175_v5  ;;  %vm117_vm15 = vcmp.lt.s32.totalorder %v851_v25, 0  ;;  %vm413_vm1 = vweird.f32 %v843_v13  ;;  %vm1002_vm2 = vcmp.le.f32.partialorder %v115_v34, 0.7853982 }
  0xc3   :  { %v375_v35 = vsel %vm373_vm5, %v374_v4, %v372_v58  ;;  %v207_v20 = vadd.s32 %v206_v16, %v197_v12  ;;  %v395_v33 = vsel %vm272_vm9, %v394_v50, %v959_v47 }
  0xc4   :  { %v376_v15 = vclz %v375_v35  ;;  %vm210_vm6 = vc.u32 %v185_v7, %v204_v0  ;;  %v397_v63 = vsel %vm987_vm10, 0, %v395_v33  ;;  %v455_v33 = vpop.f32.mrf.mxu0 }
  0xc5   :  { %v211_v21 = vadd.s32 1, %v207_v20  ;;  %v414_v11 = vadd.s32 3, %v397_v63 }
  0xc6   :  { %v589_v18 = vadd.s32 4294967294, %v376_v15 }
  0xc7   :  { %v212_v24 = vsel %vm210_vm6, %v211_v21, %v207_v20  ;;  %v415_v16 = vand.u32 3, %v414_v11  ;;  %vm258_vm6 = vweird.f32 %v851_v25 }
  0xc8   :  { %vm590_vm7 = vcmp.lt.s32.totalorder %v589_v18, 0  ;;  %v213_v26 = vadd.s32 %v212_v24, %v208_v61 }
  0xc9   :  { %v379_v22 = vsel %vm590_vm7, 0, %v589_v18  ;;  %vm417_vm12 = vcmp.eq.s32.totalorder %v415_v16, 0  ;;  %vm420_vm13 = vcmp.eq.s32.totalorder %v415_v16, 2  ;;  %vm416_vm14 = vcmp.lt.s32.totalorder %v415_v16, 2 }
  0xca   :  { %v380_v10 = vsub.s32 32, %v379_v22  ;;  %v384_v23 = vsub.s32 4294967266, %v379_v22  ;;  %v381_v28 = vshll.u32 %v372_v58, %v379_v22  ;;  %v214_v32 = vadd.s32 536870912, %v213_v26 }
  0xcb   :  { %v209_v58 = vadd.s32 %v204_v0, %v185_v7  ;;  %vm496_vm7 = vcmask 523264  }
  0xcc   :  { %v382_v29 = vshrl.u32 %v364_v27, %v380_v10  ;;  %v385_v30 = vadd.s32 127, %v384_v23  ;;  %v981_v37 = vshrl.u32 %v214_v32, 30 }
  0xce   :  { %v383_v6 = vor.u32 %v382_v29, %v381_v28  ;;  %v386_v36 = vshll.u32 %v385_v30, 23  ;;  %v216_v39 = vshll.u32 %v981_v37, 30  ;;  %v239_v29 = vsub.s32 4, %v981_v37 }
  0xd0   :  { %v387_v38 = vor.u32 4788187, %v386_v36  ;;  %v390_v62 = vcvt.s32.f32 %v383_v6  ;;  %v217_v42 = vsub.s32 %v213_v26, %v216_v39  ;;  %v240_v36 = vsel %vm117_vm15, %v239_v29, %v981_v37 }
  0xd1   :  { %v242_v39 = vsel %vm1002_vm2, 0, %v240_v36 }
  0xd2   :  { %v388_v41 = vand.u32 2147483647, %v387_v38  ;;  %vm218_vm8 = vcmp.lt.s32.totalorder %v217_v42, 0  ;;  %v219_v45 = vsub.s32 0, %v217_v42 }
  0xd4   :  { %v391_v43 = vmul.f32 %v390_v62, %v388_v41  ;;  %v220_v31 = vsel %vm218_vm8, %v219_v45, %v217_v42  ;;  %v259_v45 = vadd.s32 3, %v242_v39  ;;  %v623_v39 = vld [vmem:[%s1044_s7] ss:$0 sm:$0xff]  ;;  %s570_s7 = sshll.u32 %s1045_s8, 4  ;;  %s571_s7 = int_to_ptr.hbm [resolvable:$true] %s570_s7 }
  0xd5   :  { %v221_v48 = vclz %v220_v31 }
  0xd6   :  { %v392_v14 = vxor.u32 2147483648, %v391_v43 }
  0xd7   :  { %v586_v53 = vadd.s32 4294967294, %v221_v48  ;;  %v260_v48 = vand.u32 3, %v259_v45 }
  0xd8   :  { %v393_v46 = vsel %vm272_vm9, %v392_v14, %v391_v43 }
  0xd9   :  { %v396_v51 = vsel %vm987_vm10, %v843_v13, %v393_v46  ;;  %vm587_vm11 = vcmp.lt.s32.totalorder %v586_v53, 0  ;;  %vm262_vm3 = vcmp.eq.s32.totalorder %v260_v48, 0  ;;  %vm265_vm4 = vcmp.eq.s32.totalorder %v260_v48, 2 }
  0xda   :  { %v398_v52 = vmul.f32 %v396_v51, %v396_v51  ;;  %v224_v56 = vsel %vm587_vm11, 0, %v586_v53  ;;  %vm261_vm5 = vcmp.lt.s32.totalorder %v260_v48, 2 }
  0xdb   :  { %v225_v59 = vsub.s32 32, %v224_v56  ;;  %v229_v60 = vsub.s32 4294967266, %v224_v56  ;;  %v226_v4 = vshll.u32 %v217_v42, %v224_v56 }
  0xdc   :  { %v399_v54 = vmul.f32 -0.001358992, %v398_v52  ;;  %v406_v55 = vmul.f32 -0.00019511016, %v398_v52 }
  0xdd   :  { %v227_v3 = vshrl.u32 %v209_v58, %v225_v59  ;;  %v230_v5 = vadd.s32 127, %v229_v60  ;;  %v458_v58 = vpop.f32.mrf.mxu2 }
  0xde   :  { %v400_v17 = vadd.f32 0.041655596, %v399_v54  ;;  %v407_v57 = vadd.f32 0.008332121, %v406_v55 }
  0xdf   :  { %v228_v35 = vor.u32 %v227_v3, %v226_v4  ;;  %v231_v49 = vshll.u32 %v230_v5, 23  ;;  %v771_v3 = vmov 64.0  }
  0xe0   :  { %v401_v1 = vmul.f32 %v400_v17, %v398_v52  ;;  %v408_v2 = vmul.f32 %v407_v57, %v398_v52  ;;  %v621_v57 = vld [vmem:[%s1042_s5] ss:$0 sm:$0xff]  ;;  %624 = vrcp.f32 %v771_v3 }
  0xe1   :  { %v232_v15 = vor.u32 4788187, %v231_v49  ;;  %v235_v18 = vcvt.s32.f32 %v228_v35 }
  0xe2   :  { %v402_v8 = vadd.f32 -0.4999988, %v401_v1  ;;  %v409_v9 = vadd.f32 -0.16666654, %v408_v2 }
  0xe3   :  { %v233_v0 = vand.u32 2147483647, %v232_v15 }
  0xe4   :  { %v403_v47 = vmul.f32 %v402_v8, %v398_v52  ;;  %v410_v40 = vmul.f32 %v409_v9, %v398_v52 }
  0xe5   :  { %v236_v21 = vmul.f32 %v235_v18, %v233_v0 }
  0xe6   :  { %v404_v12 = vadd.f32 1.0, %v403_v47  ;;  %v411_v7 = vadd.f32 1.0, %v410_v40  ;;  %v625_v4 = vpop.eup %624 }
  0xe7   :  { %v237_v61 = vxor.u32 2147483648, %v236_v21  ;;  %v504_v5 = vmul.f32 64.0, %v625_v4 }
  0xe8   :  { %v412_v19 = vmul.f32 %v411_v7, %v396_v51  ;;  %v421_v20 = vxor.u32 2147483648, %v404_v12 }
  0xe9   :  { %v238_v26 = vsel %vm117_vm15, %v237_v61, %v236_v21  ;;  %v505_v8 = vsub.f32 1.0, %v504_v5 }
  0xea   :  { %v418_v22 = vxor.u32 2147483648, %v412_v19  ;;  %v422_v10 = vsel %vm420_vm13, %v421_v20, %v412_v19  ;;  %v241_v30 = vsel %vm1002_vm2, %v851_v25, %v238_v26 }
  0xeb   :  { %v243_v32 = vmul.f32 %v241_v30, %v241_v30  ;;  %v506_v9 = vmul.f32 %v625_v4, %v505_v8 }
  0xec   :  { %v419_v27 = vsel %vm417_vm12, %v404_v12, %v418_v22 }
  0xed   :  { %v423_v23 = vsel %vm416_vm14, %v419_v27, %v422_v10  ;;  %v244_v6 = vmul.f32 -0.001358992, %v243_v32  ;;  %v251_v13 = vmul.f32 -0.00019511016, %v243_v32  ;;  %v507_v11 = vadd.f32 %v625_v4, %v506_v9 }
  0xee   :  { %v424_v28 = vsel %vm413_vm1, nan, %v423_v23 }
  0xef   :  { %594 = vmatmul.msk.f32.vlgmr.msra.gmra.mxu3 %vm433_vm0, %v424_v28  ;;  %v245_v38 = vadd.f32 0.041655596, %v244_v6  ;;  %v252_v34 = vadd.f32 0.008332121, %v251_v13  ;;  %v622_v13 = vld [vmem:[%s1043_s6] ss:$0 sm:$0xff] }
  0xf0   :  { %s772_s6 = smov [#allocation10]  }
  0xf1   :  { %v246_v41 = vmul.f32 %v245_v38, %v243_v32  ;;  %v253_v62 = vmul.f32 %v252_v34, %v243_v32  ;;  %s568_s29 = sshll.u32 %s772_s6, 4  ;;  %s569_s29 = int_to_ptr.vmem [resolvable:$true] %s568_s29 }
  0xf3   :  { %v247_v42 = vadd.f32 -0.4999988, %v246_v41  ;;  %v254_v43 = vadd.f32 -0.16666654, %v253_v62 }
  0xf5   :  { %v248_v14 = vmul.f32 %v247_v42, %v243_v32  ;;  %v255_v31 = vmul.f32 %v254_v43, %v243_v32 }
  0xf7   :  { %v249_v44 = vadd.f32 1.0, %v248_v14  ;;  %v256_v46 = vadd.f32 1.0, %v255_v31 }
  0xf9   :  { %v257_v50 = vmul.f32 %v256_v46, %v241_v30  ;;  %v266_v51 = vxor.u32 2147483648, %v249_v44 }
  0xfb   :  { %v263_v52 = vxor.u32 2147483648, %v257_v50  ;;  %v267_v53 = vsel %vm265_vm4, %v266_v51, %v257_v50 }
  0xfd   :  { %v264_v37 = vsel %vm262_vm3, %v249_v44, %v263_v52 }
  0xfe   :  { %v268_v54 = vsel %vm261_vm5, %v264_v37, %v267_v53 }
  0xff   :  { %v269_v55 = vsel %vm258_vm6, nan, %v268_v54 }
 0x100   :  { %593 = vmatmul.msk.f32.vlgmr.msra.gmra.mxu1 %vm433_vm0, %v269_v55  ;;  %vm508_vm0 = vweird.f32 %v625_v4 }
 0x101   :  { %v509_v35 = vsel %vm508_vm0, %v625_v4, %v507_v11 }
 0x172   :  { %v487_v59 = vpop.f32.mrf.mxu3 }
 0x173   :  { %v488_v63 = vadd.f32 %v487_v59, %v458_v58 }
 0x175   :  { %v495_v25 = vadd.f32 %v621_v57, %v488_v63 }
 0x177   :  { %v500_v2 = vsel %vm496_vm7, %v495_v25, 0.0 }
 0x17d   :  { %v484_v56 = vpop.f32.mrf.mxu1 }
 0x17e   :  { %v485_v17 = vadd.f32 %v484_v56, %v455_v33 }
 0x180   :  { %v494_v60 = vadd.f32 %v621_v57, %v485_v17 }
 0x182   :  { %v497_v1 = vsel %vm496_vm7, %v494_v60, 0.0 }
 0x183   :  { %498 = vadd.xlane.f32.xlu1 %v497_v1 }
 0x18b   :  { %501 = vadd.xlane.f32.xlu1 %v500_v2 }
 0x1f6   :  { %v499_v49 = vpop.xlane.xlu1 %498 }
 0x1f7   :  { %v510_v47 = vmul.f32 %v509_v35, %v499_v49 }
 0x1f9   :  { %v512_v40 = vsub.f32 %v494_v60, %v510_v47 }
 0x1fb   :  { %v514_v15 = vmul.f32 %v512_v40, %v512_v40 }
 0x1fd   :  { %v516_v12 = vsel %vm496_vm7, %v514_v15, 0.0 }
 0x1fe   :  { %517 = vadd.xlane.f32.xlu2 %v516_v12  ;;  %v502_v7 = vpop.xlane.xlu1 %501 }
 0x1ff   :  { %v511_v16 = vmul.f32 %v509_v35, %v502_v7 }
 0x201   :  { %v513_v0 = vsub.f32 %v495_v25, %v511_v16 }
 0x203   :  { %v515_v18 = vmul.f32 %v513_v0, %v513_v0 }
 0x205   :  { %v519_v19 = vsel %vm496_vm7, %v515_v18, 0.0 }
 0x206   :  { %520 = vadd.xlane.f32.xlu2 %v519_v19 }
 0x271   :  { %v518_v20 = vpop.xlane.xlu2 %517 }
 0x272   :  { %v522_v21 = vmul.f32 %v518_v20, %v509_v35 }
 0x274   :  { %v524_v22 = vadd.f32 1e-05, %v522_v21 }
 0x276   :  { %626 = vrsqrt.f32 %v524_v22  ;;  %vm532_vm9 = vweird.f32 %v524_v22 }
 0x279   :  { %v521_v61 = vpop.xlane.xlu2 %520 }
 0x27a   :  { %v523_v27 = vmul.f32 %v521_v61, %v509_v35 }
 0x27c   :  { %v627_v10 = vpop.eup %626  ;;  %v525_v23 = vadd.f32 1e-05, %v523_v27 }
 0x27d   :  { %v527_v24 = vmul.f32 %v627_v10, %v524_v22  ;;  %vm533_vm8 = vweird.f32 %v627_v10 }
 0x27e   :  { %628 = vrsqrt.f32 %v525_v23  ;;  %vm534_vm10 = vmor %vm532_vm9, %vm533_vm8  ;;  %vm542_vm12 = vweird.f32 %v525_v23 }
 0x27f   :  { %v528_v26 = vmul.f32 %v627_v10, %v527_v24 }
 0x281   :  { %v529_v28 = vmul.f32 0.5, %v528_v26 }
 0x283   :  { %v530_v29 = vsub.f32 1.5, %v529_v28 }
 0x284   :  { %v629_v30 = vpop.eup %628 }
 0x285   :  { %v531_v32 = vmul.f32 %v627_v10, %v530_v29  ;;  %v537_v6 = vmul.f32 %v629_v30, %v525_v23  ;;  %vm543_vm11 = vweird.f32 %v629_v30 }
 0x286   :  { %vm544_vm13 = vmor %vm542_vm12, %vm543_vm11 }
 0x287   :  { %v535_v36 = vsel %vm534_vm10, %v627_v10, %v531_v32  ;;  %v538_v38 = vmul.f32 %v629_v30, %v537_v6 }
 0x288   :  { %v546_v34 = vmul.f32 %v535_v36, %v512_v40 }
 0x289   :  { %v539_v41 = vmul.f32 0.5, %v538_v38 }
 0x28a   :  { %v552_v62 = vmul.f32 %v622_v13, %v546_v34 }
 0x28b   :  { %v540_v42 = vsub.f32 1.5, %v539_v41 }
 0x28c   :  { %v558_v43 = vadd.f32 %v623_v39, %v552_v62 }
 0x28d   :  { %v541_v45 = vmul.f32 %v629_v30, %v540_v42 }
 0x28e   :  { %v560_v14 = vmax.f32 %v558_v43, 0.0 }
 0x28f   :  { %v545_v31 = vsel %vm544_vm13, %v629_v30, %v541_v45 }
 0x290   :  { %v547_v44 = vmul.f32 %v545_v31, %v513_v0  ;;  %562 = vst.msk [vmem:[#allocation10] sm:$0xff] %vm496_vm7, %v560_v14 }
 0x292   :  { %v553_v46 = vmul.f32 %v622_v13, %v547_v44 }
 0x294   :  { %v559_v48 = vadd.f32 %v623_v39, %v553_v46 }
 0x296   :  { %v561_v50 = vmax.f32 %v559_v48, 0.0 }
 0x298   :  { %563 = vst.msk [vmem:[#allocation10 + $0x8] sm:$0xff] %vm496_vm7, %v561_v50 }
 0x299   :  { %576 = dma.vmem_to_hbm [thread:$0]  %s569_s29, 256, %s571_s7, [#allocation4], %s760_s15, %s760_s15, %s761_s16  }
 0x29a   :  { %756 = dma.done.wait [#allocation4], 256  }
 0x29b   :  { %757 = vsyncadd [#allocation4], 4294967040 }
 0x29c   :  { %581 = vsyncpa [#allocation3], 1 }
 0x29d   :  { %582 = vsyncpa [#allocation6], 1 }
 0x29e   :  { %583 = vsyncpa [#allocation9], 1 }
 0x29f   :  { %584 = vsyncpa [#allocation4], 1 }

</bundles_post_ra>
